<compile_context>
chip_gen: v7x
topology: tpu7x:2x2x1
jax: 0.10.0
libtpu: 0.0.40
codegen_flags: <defaults>
</compile_context>

<pallas_src>
import functools

import jax
import jax.numpy as jnp
from jax import lax
from jax.experimental import pallas as pl
from jax.experimental.pallas import tpu as pltpu

LANE = 128             # TPU lane width (minor dim)
SUB = 8                # f32 sublane width
ROW_ALIGN = 16         # keep slab regions 16-row aligned (bf16 sublane packing)
MAX_BATCH_TILE = 1024  # rows per grid step at large batch


def _round_up(n, m):
    return (n + m - 1) // m * m


def _layout(state_size, fc1, fc2, action_size):
    """Row layout of the packed bf16 parameter slab (width d, lane-aligned)."""
    d = _round_up(max(fc1, fc2), LANE)        # hidden/lane width (128 for 64/64)
    act_pad = _round_up(action_size, SUB)     # padded action rows for the output
    o_w1 = 0
    o_b1 = o_w1 + _round_up(state_size, ROW_ALIGN)   # W1: (state_size, fc1) region
    o_w2 = o_b1 + ROW_ALIGN                          # b1: row 0 of a 16-row region
    o_b2 = o_w2 + d                                  # W2: (d, d) region
    o_w3t = o_b2 + ROW_ALIGN                         # b2: row 0 of a 16-row region
    o_b3 = o_w3t + _round_up(act_pad, ROW_ALIGN)     # W3^T: (act_pad, fc2) region
    rows = o_b3 + ROW_ALIGN                          # b3: column 0 of a 16-row region
    return dict(state_size=state_size, fc1=fc1, fc2=fc2, action_size=action_size,
                d=d, act_pad=act_pad, o_b1=o_b1, o_w2=o_w2, o_b2=o_b2,
                o_w3t=o_w3t, o_b3=o_b3, rows=rows)


def _mlp_kernel(x_ref, p_ref, out_ref, *, meta):
    """Fused 3-layer MLP.  x_ref: (b_tile, state_size) f32 (unpadded),
    p_ref: packed bf16 slab, out_ref: (act_pad, b_tile) f32 (transposed)."""
    s = meta["state_size"]
    d = meta["d"]
    act_pad = meta["act_pad"]
    o_b1, o_w2 = meta["o_b1"], meta["o_w2"]
    o_b2, o_w3t, o_b3 = meta["o_b2"], meta["o_w3t"], meta["o_b3"]

    x = x_ref[...].astype(jnp.bfloat16)                         # (bt, s)

    # fc1 + relu: contract over the real state_size; bf16 MXU, f32 accumulate.
    h = jnp.dot(x, p_ref[0:s, :], preferred_element_type=jnp.float32)
    h = jnp.maximum(h + p_ref[o_b1:o_b1 + 1, :].astype(jnp.float32), 0.0)

    # fc2 + relu (padded hidden columns of h are exactly zero).
    h = jnp.dot(h.astype(jnp.bfloat16), p_ref[o_w2:o_w2 + d, :],
                preferred_element_type=jnp.float32)
    h = jnp.maximum(h + p_ref[o_b2:o_b2 + 1, :].astype(jnp.float32), 0.0)

    # fc3, emitted transposed: (act_pad, bt) so the HBM store is narrow and
    # lane-dense (batch is the lane dim).  Contract w3t dim1 with h dim1.
    w3t = p_ref[o_w3t:o_w3t + act_pad, :]                       # (act_pad, d)
    y = lax.dot_general(w3t, h.astype(jnp.bfloat16),
                        (((1,), (1,)), ((), ())),
                        preferred_element_type=jnp.float32)      # (act_pad, bt)
    y = y + p_ref[o_b3:o_b3 + act_pad, 0:1].astype(jnp.float32)  # lane-broadcast bias
    out_ref[...] = y.astype(out_ref.dtype)


def pack_params(params):
    """Pack (w1,b1,w2,b2,w3,b3) into one zero-padded bf16 slab + static layout.

    Weights use (in_features, out_features) layout (transposed vs torch) so the
    kernel computes y = x @ W + b directly; W3 is additionally stored transposed
    so the last layer can be emitted as (action, batch) without a big transpose.
    Zero padding is mathematically inert through the ReLUs.
    """
    w1 = jnp.asarray(params["w1"], jnp.float32)
    b1 = jnp.asarray(params["b1"], jnp.float32).reshape(-1)
    w2 = jnp.asarray(params["w2"], jnp.float32)
    b2 = jnp.asarray(params["b2"], jnp.float32).reshape(-1)
    w3 = jnp.asarray(params["w3"], jnp.float32)
    b3 = jnp.asarray(params["b3"], jnp.float32).reshape(-1)

    state_size, fc1 = w1.shape
    fc2 = w2.shape[1]
    action_size = w3.shape[1]
    meta = _layout(state_size, fc1, fc2, action_size)
    d, rows = meta["d"], meta["rows"]

    slab = jnp.zeros((rows, d), jnp.float32)
    slab = slab.at[0:state_size, 0:fc1].set(w1)
    slab = slab.at[meta["o_b1"], 0:fc1].set(b1)
    slab = slab.at[meta["o_w2"]:meta["o_w2"] + fc1, 0:fc2].set(w2)
    slab = slab.at[meta["o_b2"], 0:fc2].set(b2)
    slab = slab.at[meta["o_w3t"]:meta["o_w3t"] + action_size, 0:fc2].set(w3.T)
    slab = slab.at[meta["o_b3"]:meta["o_b3"] + action_size, 0].set(b3)
    return slab.astype(jnp.bfloat16), meta


def _batch_tiling(batch):
    """Pick (b_tile, grid_steps) for the batch axis."""
    if batch < 2 * LANE:
        # Tiny batches: one step; splitting can't amortize the ~0.35 us step cost.
        return _round_up(batch, SUB), 1
    # >= 2 steps so both v7x TensorCores engage on the "parallel" axis; keep the
    # transposed output lane-dense (tile multiple of 128) and cap the tile so
    # per-step VMEM and v5e's single vector-store slot stay comfortable.
    tile = min(MAX_BATCH_TILE, _round_up(-(-batch // 2), LANE))
    return tile, -(-batch // tile)


def neural_net_forward(state, slab, meta):
    """state: (B, state_size) float32.  slab/meta: from pack_params."""
    B, s = state.shape
    assert s == meta["state_size"], "state feature dim mismatch"
    d, act_pad, rows = meta["d"], meta["act_pad"], meta["rows"]
    action_size = meta["action_size"]

    b_tile, steps = _batch_tiling(B)
    out_cols = steps * b_tile

    flops = 2 * B * (s * meta["fc1"] + meta["fc1"] * meta["fc2"]
                     + meta["fc2"] * action_size)
    bytes_accessed = B * s * 4 + act_pad * out_cols * 4 + rows * d * 2

    out = pl.pallas_call(
        functools.partial(_mlp_kernel, meta=meta),
        out_shape=jax.ShapeDtypeStruct((act_pad, out_cols), jnp.float32),
        grid=(steps,),
        in_specs=[
            # Activations: unpadded, full real last dim (no host-side pad pass);
            # a ragged last batch block is handled by Pallas and its junk rows
            # land only in output columns >= B, which are sliced off below.
            pl.BlockSpec((b_tile, s), lambda i: (i, 0)),
            # Packed params: constant index_map -> DMA'd once, VMEM-resident.
            pl.BlockSpec((rows, d), lambda i: (0, 0)),
        ],
        out_specs=pl.BlockSpec((act_pad, b_tile), lambda i: (0, i)),
        compiler_params=pltpu.CompilerParams(dimension_semantics=("parallel",)),
        cost_estimate=pl.CostEstimate(flops=flops, transcendentals=0,
                                      bytes_accessed=bytes_accessed),
    )(state.astype(jnp.float32), slab)

    # (act_pad, out_cols) -> (B, action_size); the transpose is tiny (4 x B).
    return out[:action_size, :B].T


def init_params(key, state_size, action_size, fc1_units=64, fc2_units=64):
    """Deterministic init mimicking PyTorch nn.Linear default (U[-1/sqrt(fan_in), +])."""
    def linear(k, fan_in, fan_out):
        kw, kb = jax.random.split(k)
        bound = 1.0 / jnp.sqrt(jnp.float32(fan_in))
        w = jax.random.uniform(kw, (fan_in, fan_out), jnp.float32, -bound, bound)
        b = jax.random.uniform(kb, (fan_out,), jnp.float32, -bound, bound)
        return w, b

    k1, k2, k3 = jax.random.split(key, 3)
    w1, b1 = linear(k1, state_size, fc1_units)
    w2, b2 = linear(k2, fc1_units, fc2_units)
    w3, b3 = linear(k3, fc2_units, action_size)
    return {"w1": w1, "b1": b1, "w2": w2, "b2": b2, "w3": w3, "b3": b3}


def _reference(state, p):
    h1 = jnp.maximum(state @ p["w1"] + p["b1"], 0.0)
    h2 = jnp.maximum(h1 @ p["w2"] + p["b2"], 0.0)
    return h2 @ p["w3"] + p["b3"]


if __name__ == "__main__":
    # Banana-env-like sizes: state_size=37, action_size=4, fc1=fc2=64
    batch, state_size, action_size = 8, 37, 4

    key = jax.random.PRNGKey(0)
    k_params, k_state = jax.random.split(key)
    params = init_params(k_params, state_size, action_size)
    slab, meta = pack_params(params)
    state = jax.random.normal(k_state, (batch, state_size), jnp.float32)

    out = jax.block_until_ready(neural_net_forward(state, slab, meta))
    ref = _reference(state, params)
    assert out.shape == (batch, action_size)
    # bf16 parameter/activation storage -> loose-but-meaningful tolerance
    # (structural bugs would produce O(0.1-1) deviations).
    assert jnp.allclose(out, ref, atol=3e-2, rtol=3e-2)
    print("KERNEL_OK")
</pallas_src>

<mosaic_0001>
module attributes {stable_mosaic.version = 11 : i64} {
  func.func @_mlp_kernel(%arg0: i32, %arg1: memref<8x37xf32, #tpu.memory_space<vmem>>, %arg2: memref<240x128xbf16, #tpu.memory_space<vmem>>, %arg3: memref<8x8xf32, #tpu.memory_space<vmem>>) attributes {dimension_semantics = [#tpu.dimension_semantics<parallel>], iteration_bounds = array<i64: 1>, scalar_prefetch = 0 : i64, scratch_operands = 0 : i64, tpu.core_type = #tpu.core_type<tc>, window_params = [{transform_indices = @transform_0, window_bounds = array<i64: 8, 37>}, {pipeline_mode = #tpu.pipeline_mode<synchronous>, transform_indices = @transform_1, window_bounds = array<i64: 240, 128>}, {transform_indices = @transform_2, window_bounds = array<i64: 8, 8>}]} {
    %c0 = arith.constant 0 : index
    %c0_0 = arith.constant 0 : index
    %0 = vector.load %arg1[%c0, %c0_0] : memref<8x37xf32, #tpu.memory_space<vmem>>, vector<8x37xf32>
    %1 = arith.truncf %0 : vector<8x37xf32> to vector<8x37xbf16>
    %c0_1 = arith.constant 0 : index
    %c0_2 = arith.constant 0 : index
    %2 = vector.load %arg2[%c0_1, %c0_2] : memref<240x128xbf16, #tpu.memory_space<vmem>>, vector<37x128xbf16>
    %cst = arith.constant dense<0.000000e+00> : vector<8x128xf32>
    %3 = tpu.matmul %1, %2, %cst {dimension_numbers = #tpu.dot_dimension_numbers<[1], [0], [0], [1], [0, 0, 1, 1], [], []>} : vector<8x37xbf16>, vector<37x128xbf16>, vector<8x128xf32> -> vector<8x128xf32>
    %c48 = arith.constant 48 : index
    %c0_3 = arith.constant 0 : index
    %4 = vector.load %arg2[%c48, %c0_3] : memref<240x128xbf16, #tpu.memory_space<vmem>>, vector<1x128xbf16>
    %5 = arith.extf %4 : vector<1x128xbf16> to vector<1x128xf32>
    %6 = vector.broadcast %5 : vector<1x128xf32> to vector<8x128xf32>
    %7 = arith.addf %3, %6 : vector<8x128xf32>
    %cst_4 = arith.constant 0.000000e+00 : f32
    %8 = vector.broadcast %cst_4 : f32 to vector<8x128xf32>
    %9 = arith.maximumf %7, %8 : vector<8x128xf32>
    %10 = arith.truncf %9 : vector<8x128xf32> to vector<8x128xbf16>
    %c64 = arith.constant 64 : index
    %c0_5 = arith.constant 0 : index
    %11 = vector.load %arg2[%c64, %c0_5] : memref<240x128xbf16, #tpu.memory_space<vmem>>, vector<128x128xbf16>
    %cst_6 = arith.constant dense<0.000000e+00> : vector<8x128xf32>
    %12 = tpu.matmul %10, %11, %cst_6 {dimension_numbers = #tpu.dot_dimension_numbers<[1], [0], [0], [1], [0, 0, 1, 1], [], []>} : vector<8x128xbf16>, vector<128x128xbf16>, vector<8x128xf32> -> vector<8x128xf32>
    %c192 = arith.constant 192 : index
    %c0_7 = arith.constant 0 : index
    %13 = vector.load %arg2[%c192, %c0_7] : memref<240x128xbf16, #tpu.memory_space<vmem>>, vector<1x128xbf16>
    %14 = arith.extf %13 : vector<1x128xbf16> to vector<1x128xf32>
    %15 = vector.broadcast %14 : vector<1x128xf32> to vector<8x128xf32>
    %16 = arith.addf %12, %15 : vector<8x128xf32>
    %cst_8 = arith.constant 0.000000e+00 : f32
    %17 = vector.broadcast %cst_8 : f32 to vector<8x128xf32>
    %18 = arith.maximumf %16, %17 : vector<8x128xf32>
    %c208 = arith.constant 208 : index
    %c0_9 = arith.constant 0 : index
    %19 = vector.load %arg2[%c208, %c0_9] : memref<240x128xbf16, #tpu.memory_space<vmem>>, vector<8x128xbf16>
    %20 = arith.truncf %18 : vector<8x128xf32> to vector<8x128xbf16>
    %cst_10 = arith.constant dense<0.000000e+00> : vector<8x8xf32>
    %21 = tpu.matmul %19, %20, %cst_10 {dimension_numbers = #tpu.dot_dimension_numbers<[1], [1], [0], [0], [0, 0, 1, 0], [], []>} : vector<8x128xbf16>, vector<8x128xbf16>, vector<8x8xf32> -> vector<8x8xf32>
    %c224 = arith.constant 224 : index
    %c0_11 = arith.constant 0 : index
    %22 = vector.load %arg2[%c224, %c0_11] : memref<240x128xbf16, #tpu.memory_space<vmem>>, vector<8x1xbf16>
    %23 = arith.extf %22 : vector<8x1xbf16> to vector<8x1xf32>
    %24 = vector.broadcast %23 : vector<8x1xf32> to vector<8x8xf32>
    %25 = arith.addf %21, %24 : vector<8x8xf32>
    %c0_12 = arith.constant 0 : index
    %c0_13 = arith.constant 0 : index
    %26 = vector.load %arg3[%c0_12, %c0_13] : memref<8x8xf32, #tpu.memory_space<vmem>>, vector<8x8xf32>
    tpu.vector_store %arg3[%c0_12, %c0_13], %25 {strides = array<i32>} : memref<8x8xf32, #tpu.memory_space<vmem>>, vector<8x8xf32>,
    return
  }
  func.func @transform_0(%arg0: i32) -> (i32, i32) {
    %c0_i32 = arith.constant 0 : i32
    %c0_i32_0 = arith.constant 0 : i32
    return %arg0, %c0_i32 : i32, i32
  }
  func.func @transform_1(%arg0: i32) -> (i32, i32) {
    %c0_i32 = arith.constant 0 : i32
    %c0_i32_0 = arith.constant 0 : i32
    %c0_i32_1 = arith.constant 0 : i32
    return %c0_i32, %c0_i32_0 : i32, i32
  }
  func.func @transform_2(%arg0: i32) -> (i32, i32) {
    %c0_i32 = arith.constant 0 : i32
    %c0_i32_0 = arith.constant 0 : i32
    return %c0_i32, %arg0 : i32, i32
  }
}

</mosaic_0001>

<bundles_post_ra>
// kernel: tpu_custom_call.1
= control target key start
LH: loop header
LB: loop body
LE: loop exit
PB: predicated region body
PF: predicated region fallthrough
CT: control target
= control target key end

     0   :  { %7 = vsyncpa [#allocation3], 0  ;;  %s524_s0 = inlined_call_operand.hbm [shape: f32[8,37], index: 0, kind: input, shape index: {}]   ;;  %s525_s1 = inlined_call_operand.hbm [shape: bf16[240,128], index: 1, kind: input, shape index: {}]   ;;  %s526_s2 = inlined_call_operand.hbm [shape: f32[8,8], index: 2, kind: output, shape index: {}]  }
   0x1   :  { %8 = vsyncpa [#allocation6], 0 }
   0x2   :  { %9 = vsyncpa [#allocation4], 0  ;;  %s454_s9 = smov [#allocation2]   ;;  %s455_s11 = smov [#allocation5]  }
   0x3   :  { %s16_s10 = sshll.u32 %s454_s9, 4  ;;  %s25_s12 = sshll.u32 %s455_s11, 4  ;;  %s17_s10 = int_to_ptr.vmem [resolvable:$true] %s16_s10  ;;  %s478_s12 = int_to_ptr.vmem [resolvable:$true] %s25_s12 }
   0x4   :  { %s382_s15 = scalar_lea.hbm %s524_s0, 128 }
   0x5   :  { %p383_p0 = scmp.ne.s32.totalorder %s524_s0, %s382_s15  ;;  %p386_p1 = scmp.lt.u32.totalorder %s382_s15, %s524_s0 }
   0x7   :  { %p388_p2 = pnand %p386_p1, %p383_p0 }
   0x9   :  { %391 = shalt.err (!%p388_p2)
}
   0xa   :  { %s392_s20 = scalar_lea.vmem %s17_s10, 128  ;;  %p397_p4 = scmp.lt.s32.totalorder %s17_s10, %s17_s10 }
   0xb   :  { %p393_p3 = scmp.ne.s32.totalorder %s17_s10, %s392_s20  ;;  %p398_p5 = scmp.lt.s32.totalorder %s392_s20, %s392_s20 }
   0xd   :  { %p399_p6 = por %p398_p5, %p397_p4 }
   0xf   :  { %p400_p7 = pnand %p399_p6, %p393_p3 }
  0x11   :  { %403 = shalt.err (!%p400_p7)
}
  0x12   :  { %19 = dma.hbm_to_vmem [thread:$0]  %s524_s0, 128, %s17_s10, [#allocation3]  }
  0x13   :  { %s404_s25 = scalar_lea.hbm %s525_s1, 1920 }
  0x14   :  { %p405_p8 = scmp.ne.s32.totalorder %s525_s1, %s404_s25  ;;  %p408_p9 = scmp.lt.u32.totalorder %s404_s25, %s525_s1 }
  0x16   :  { %p410_p10 = pnand %p408_p9, %p405_p8 }
  0x18   :  { %413 = shalt.err (!%p410_p10)
}
  0x19   :  { %s414_s30 = scalar_lea.vmem %s478_s12, 1920  ;;  %p419_p12 = scmp.lt.s32.totalorder %s478_s12, %s478_s12 }
  0x1a   :  { %p415_p11 = scmp.ne.s32.totalorder %s478_s12, %s414_s30  ;;  %p420_p13 = scmp.lt.s32.totalorder %s414_s30, %s414_s30 }
  0x1c   :  { %p421_p0 = por %p420_p13, %p419_p12 }
  0x1e   :  { %p422_p1 = pnand %p421_p0, %p415_p11 }
  0x20   :  { %425 = shalt.err (!%p422_p1)
}
  0x21   :  { %s456_s0 = smov 64   ;;  %s457_s3 = smov 4  }
  0x22   :  { %31 = dma.hbm_to_vmem [thread:$0]  %s525_s1, 1920, %s478_s12, [#allocation6], %s456_s0, %s456_s0, %s457_s3  }
  0x23   :  { %448 = dma.done.wait [#allocation3], 128  }
  0x24   :  { %449 = vsyncadd [#allocation3], 4294967168 }
  0x25   :  { %450 = dma.done.wait [#allocation6], 1920  }
  0x26   :  { %451 = vsyncadd [#allocation6], 4294965376  ;;  %v458_v0 = vmov 0.0   ;;  %vm459_vm0 = vmmov 0   ;;  %vm71_vm1 = vcmask 1041408   ;;  %vm72_vm2 = vcmask 1042432  }
  0x27   :  { %325 = vmatprep.subr.bf16.mxu0 %v458_v0  ;;  %335 = vmatprep.subr.bf16.mxu1 %v458_v0  ;;  %v371_v1 = vld [vmem:[#allocation5] sm:$0xff]   ;;  %v460_v2 = vmov 65535   ;;  %v372_v4 = vld [vmem:[#allocation5 + $0x8] sm:$0xff]   ;;  %v373_v5 = vld [vmem:[#allocation5 + $0x10] ss:$0 sps:$4 sm:$0x77]   ;;  %v48_v18 = vlaneseq }
  0x28   :  { %331 = vmatprep.mubr.msk.bf16.mxu0 %vm459_vm0, %v458_v0  ;;  %351 = vmatprep.mubr.msk.bf16.mxu1 %vm459_vm0, %v458_v0  ;;  %v73_v3 = vsel %vm71_vm1, 4294967295, %v460_v2  ;;  %v374_v7 = vld [vmem:[#allocation5 + $0x20] sm:$0xff]   ;;  %v375_v8 = vld [vmem:[#allocation5 + $0x28] sm:$0xff]   ;;  %v39_v10 = vld [vmem:[#allocation2] sm:$0xff]  ;;  %vm67_vm3 = vcmask 302080   ;;  %v461_v32 = vmov 0  }
  0x29   :  { %326 = vmatpush3.bf16.msra.mxu0 %v371_v1  ;;  %v74_v6 = vsel %vm72_vm2, %v73_v3, 0  ;;  %336 = vmatpush3.bf16.msra.mxu1 %v374_v7  ;;  %v40_v11 = vpack.c.bf16 %v39_v10, %v39_v10  ;;  %v376_v12 = vld [vmem:[#allocation5 + $0x30] sm:$0xff]   ;;  %v377_v13 = vld [vmem:[#allocation5 + $0x38] sm:$0xff]   ;;  %v378_v14 = vld [vmem:[#allocation5 + $0x40] sm:$0xff]   ;;  %v49_v19 = vshrl.u32 %v48_v18, 7  ;;  %s462_s1 = smov [#allocation7]  }
  0x2a   :  { %327 = vmatprep.subr.bf16.mxu0 %v458_v0  ;;  %v76_v9 = vand.u32 %v373_v5, %v74_v6  ;;  %337 = vmatprep.subr.bf16.mxu1 %v458_v0  ;;  %v379_v15 = vld [vmem:[#allocation5 + $0x48] sm:$0xff]   ;;  %v380_v16 = vld [vmem:[#allocation5 + $0x50] sm:$0xff]   ;;  %v381_v17 = vld [vmem:[#allocation5 + $0x58] sm:$0xff]   ;;  %s288_s6 = sshll.u32 %s462_s1, 4  ;;  %vm280_vm4 = vcmask 64512   ;;  %s289_s6 = int_to_ptr.vmem [resolvable:$true] %s288_s6 }
  0x2b   :  { %v46_v20 = vld [vmem:[#allocation5 + $0x18] sm:$0x1]  ;;  %v50_v22 = vsub.s32 0, %v49_v19  ;;  %v233_v31 = vld [vmem:[#allocation5 + $0x70] sm:$0xf]  ;;  %370 = vset.pattern.permute.xlu0 %v461_v32  ;;  %s426_s7 = scalar_lea.vmem %s289_s6, 128  ;;  %p431_p3 = scmp.lt.s32.totalorder %s289_s6, %s289_s6 }
  0x2c   :  { %v47_v21 = vunpack.c.l.bf16 %v46_v20  ;;  %v234_v33 = vunpack.c.l.bf16 %v233_v31  ;;  %v136_v34 = vld [vmem:[#allocation5 + $0x60] sm:$0x1]  ;;  %v231_v44 = vld [vmem:[#allocation5 + $0x68] sm:$0xf]  ;;  %p427_p2 = scmp.ne.s32.totalorder %s289_s6, %s426_s7  ;;  %p432_p4 = scmp.lt.s32.totalorder %s426_s7, %s426_s7 }
  0x2d   :  { %328 = vmatpush3.bf16.msra.mxu0 %v372_v4  ;;  %338 = vmatpush3.bf16.msra.mxu1 %v375_v8  ;;  %v137_v35 = vunpack.c.l.bf16 %v136_v34 }
  0x2e   :  { %329 = vmatprep.subr.bf16.mxu0 %v458_v0  ;;  %339 = vmatprep.subr.bf16.mxu1 %v458_v0  ;;  %v51_v23 = vrot.slane %v47_v21, %v50_v22  ;;  %p433_p5 = por %p432_p4, %p431_p3 }
  0x2f   :  { %237 = vperm.xlu0 %370, %v234_v33   ;;  %v141_v36 = vrot.slane %v137_v35, %v50_v22 }
  0x30   :  { %p434_p6 = pnand %p433_p5, %p427_p2 }
  0x31   :  { %330 = vmatpush3.bf16.msra.mxu0 %v76_v9  ;;  %340 = vmatpush3.bf16.msra.mxu1 %v376_v12 }
  0x32   :  { %355 = vmatprep.subr.bf16.mxu0 %v458_v0  ;;  %341 = vmatprep.subr.bf16.mxu1 %v458_v0 }
  0x34   :  { %332 = vmatmul.mubr.msk.bf16.vlgmr.msra.gmra.mrb[0].mxu0 %vm67_vm3, %v40_v11 }
  0x35   :  { %357 = vmatprep.mubr.msk.bf16.mxu0 %vm459_vm0, %v458_v0  ;;  %342 = vmatpush3.bf16.msra.mxu1 %v377_v13 }
  0x36   :  { %343 = vmatprep.subr.bf16.mxu1 %v458_v0 }
  0x39   :  { %344 = vmatpush3.bf16.msra.mxu1 %v378_v14 }
  0x3a   :  { %345 = vmatprep.subr.bf16.mxu1 %v458_v0 }
  0x3d   :  { %346 = vmatpush3.bf16.msra.mxu1 %v379_v15 }
  0x3e   :  { %347 = vmatprep.subr.bf16.mxu1 %v458_v0 }
  0x41   :  { %348 = vmatpush3.bf16.msra.mxu1 %v380_v16 }
  0x42   :  { %349 = vmatprep.subr.bf16.mxu1 %v458_v0 }
  0x45   :  { %350 = vmatpush3.bf16.msra.mxu1 %v381_v17 }
  0xae   :  { %v238_v45 = vpop.permute.xlu0 %237 }
 0x107   :  { %v112_v24 = vpop.f32.mrb[0].mxu0 }
 0x108   :  { %v113_v25 = vadd.f32 %v112_v24, %v51_v23  ;;  %v333_v26 = vpop.f32.mrb[1].mxu0 }
 0x109   :  { %v115_v27 = vpop.f32.mrb[2].mxu0 }
 0x10a   :  { %v118_v28 = vmax.f32 %v113_v25, 0.0  ;;  %v334_v29 = vpop.f32.mrb[3].mxu0 }
 0x10c   :  { %v119_v30 = vpack.c.bf16 %v118_v28, %v118_v28 }
 0x10e   :  { %352 = vmatmul.mubr.bf16.vlgmr.msra.gmra.mrb[0].mxu1 %v119_v30 }
 0x1e1   :  { %v224_v37 = vpop.f32.mrb[0].mxu1 }
 0x1e2   :  { %v225_v38 = vadd.f32 %v224_v37, %v141_v36  ;;  %v353_v39 = vpop.f32.mrb[1].mxu1 }
 0x1e3   :  { %v227_v40 = vpop.f32.mrb[2].mxu1 }
 0x1e4   :  { %v230_v41 = vmax.f32 %v225_v38, 0.0  ;;  %v354_v42 = vpop.f32.mrb[3].mxu1 }
 0x1e6   :  { %v232_v43 = vpack.c.bf16 %v230_v41, %v230_v41 }
 0x1e8   :  { %356 = vmatpush3.bf16.xpose.msra.mxu0 %v232_v43 }
 0x1ef   :  { %358 = vmatmul.mubr.bf16.vlgmr.msra.gmra.mrb[4].mxu0 %v231_v44 }
 0x2c2   :  { %v274_v46 = vpop.f32.mrb[4].mxu0 }
 0x2c3   :  { %v275_v47 = vadd.f32 %v274_v46, %v238_v45  ;;  %v359_v48 = vpop.f32.mrb[5].mxu0 }
 0x2c4   :  { %v277_v49 = vpop.f32.mrb[6].mxu0 }
 0x2c5   :  { %v360_v50 = vpop.f32.mrb[7].mxu0  ;;  %281 = vst.msk [vmem:[#allocation7] sm:$0xff] %vm280_vm4, %v275_v47 }
 0x2c6   :  { %437 = shalt.err (!%p434_p6)
}
 0x2c7   :  { %s438_s10 = scalar_lea.hbm %s526_s2, 128 }
 0x2c8   :  { %p439_p7 = scmp.ne.s32.totalorder %s526_s2, %s438_s10  ;;  %p442_p8 = scmp.lt.u32.totalorder %s438_s10, %s526_s2 }
 0x2ca   :  { %p444_p9 = pnand %p442_p8, %p439_p7 }
 0x2cc   :  { %447 = shalt.err (!%p444_p9)
}
 0x2cd   :  { %291 = dma.vmem_to_hbm [thread:$0]  %s289_s6, 128, %s526_s2, [#allocation4]  }
 0x2ce   :  { %452 = dma.done.wait [#allocation4], 128  }
 0x2cf   :  { %453 = vsyncadd [#allocation4], 4294967168 }
 0x2d0   :  { %295 = vsyncpa [#allocation3], 1 }
 0x2d1   :  { %296 = vsyncpa [#allocation6], 1 }
 0x2d2   :  { %297 = vsyncpa [#allocation4], 1 }

</bundles_post_ra>
